<compile_context>
chip_gen: v7x
topology: tpu7x:2x2x1
jax: 0.10.0
libtpu: 0.0.40
codegen_flags: <defaults>
</compile_context>

<pallas_src>
import math
import jax
import jax.numpy as jnp
from jax.experimental import pallas as pl
from jax.experimental.pallas import tpu as pltpu


def get_sinusoid_encoding(n_position, d_model):
    """Sinusoidal positional embeddings, shape [n_position, d_model] (f32).
    Handles odd d_model gracefully (matches PyTorch reference for even d)."""
    position = jnp.arange(n_position, dtype=jnp.float32)[:, None]
    half = (d_model + 1) // 2
    div_term = jnp.exp(
        jnp.arange(half, dtype=jnp.float32) * 2.0 * -(math.log(10000.0) / d_model)
    )
    ang = position * div_term                      # [N, half]
    pe = jnp.zeros((n_position, 2 * half), dtype=jnp.float32)
    pe = pe.at[:, 0::2].set(jnp.sin(ang))
    pe = pe.at[:, 1::2].set(jnp.cos(ang))
    return pe[:, :d_model]


def _patch_embed_kernel(patches_ref, w_ref, posb_ref, out_ref):
    # patches_ref: (TM, K) bf16 | w_ref: (K, Ep) bf16
    # posb_ref:    (TM, Ep) f32 | out_ref: (TM, Ep) out_dtype
    y = jnp.dot(patches_ref[...], w_ref[...],
                preferred_element_type=jnp.float32)            # MXU, f32 accumulate
    out_ref[...] = (y + posb_ref[...]).astype(out_ref.dtype)   # bias+pos already folded


def _choose_m_tile(n_tokens, batch, max_tile=1024):
    """Largest tile that divides N (so the pos-embed block index is well
    defined), is a multiple of 16 (bf16 sublane packing), and keeps >= 2 grid
    steps when the problem allows (v7x has 2 TensorCores)."""
    cap = min(n_tokens, max_tile)
    cands = [t for t in range(16, cap + 1, 16) if n_tokens % t == 0]
    if not cands:  # tiny / odd N: fall back to sublane-aligned divisors, then N itself
        cands = [t for t in range(8, cap + 1, 8) if n_tokens % t == 0] or [n_tokens]
    tm = max(cands)
    while batch * (n_tokens // tm) < 2 and any(t < tm for t in cands):
        tm = max(t for t in cands if t < tm)
    return tm


def precompute_patch_embed_params(conv_w, conv_b, n_tokens):
    """One-time prep (hoisted out of the steady-state call): flattened bf16
    weights [K, Ep] and f32 (pos-embed + conv bias) table [N, Ep], both
    lane-padded to Ep = ceil(E/128)*128."""
    E, C, P, _ = conv_w.shape
    K = C * P * P
    w_flat = conv_w.reshape(E, K).T.astype(jnp.bfloat16)       # [K, E] bf16
    posb = get_sinusoid_encoding(n_tokens, E) + conv_b[None, :].astype(jnp.float32)
    Ep = pl.cdiv(E, 128) * 128
    if Ep != E:
        w_flat = jnp.pad(w_flat, ((0, 0), (0, Ep - E)))
        posb = jnp.pad(posb, ((0, 0), (0, Ep - E)))
    return w_flat, posb


def patch_embed(x, w_flat, posb, patch_size, embed_dim, out_dtype=jnp.bfloat16):
    """x: [B, C, H, W] f32; w_flat: [K, Ep] bf16; posb: [N, Ep] f32.
    Returns [B, N, embed_dim] with N = (H//P)*(W//P)."""
    B, C, H, W = x.shape
    P = patch_size
    Hp, Wp = H // P, W // P
    N = Hp * Wp
    K = C * P * P
    M = B * N
    Ep = w_flat.shape[1]
    assert posb.shape == (N, Ep), (posb.shape, (N, Ep))

    # Patchify: flatten (c, kh, kw) to match PyTorch Conv2d weight layout, then
    # collapse batch into the matmul M dim. bf16 cast halves the big HBM stream.
    patches = (x.reshape(B, C, Hp, P, Wp, P)
                 .transpose(0, 2, 4, 1, 3, 5)
                 .reshape(M, K)
                 .astype(jnp.bfloat16))

    TM = _choose_m_tile(N, B)
    n_tok_blocks = N // TM
    grid = (M // TM,)

    posb_map = (lambda i: (0, 0)) if n_tok_blocks == 1 \
        else (lambda i: (i % n_tok_blocks, 0))

    # VMEM budget (double-buffered streams), capped with headroom for v7x 64 MiB.
    out_bytes = jnp.dtype(out_dtype).itemsize
    est = 2 * (TM * K * 2 + K * Ep * 2 + TM * Ep * 4 + TM * Ep * out_bytes)
    vmem_limit = int(min(max(4 * est, 16 << 20), 48 << 20))

    out = pl.pallas_call(
        _patch_embed_kernel,
        out_shape=jax.ShapeDtypeStruct((M, Ep), out_dtype),
        grid_spec=pltpu.PrefetchScalarGridSpec(
            num_scalar_prefetch=0,
            grid=grid,
            in_specs=[
                pl.BlockSpec((TM, K), lambda i: (i, 0)),   # patches tile (contiguous DMA)
                pl.BlockSpec((K, Ep), lambda i: (0, 0)),   # weights, fetched once / resident
                pl.BlockSpec((TM, Ep), posb_map),          # pos+bias, resident when TM == N
            ],
            out_specs=pl.BlockSpec((TM, Ep), lambda i: (i, 0)),
        ),
        compiler_params=pltpu.CompilerParams(
            dimension_semantics=("parallel",),
            # Let XLA fuse the patchify transpose/cast into the kernel's input
            # pipeline instead of round-tripping `patches` via HBM.
            allow_input_fusion=[True, False, False],
            vmem_limit_bytes=vmem_limit,
        ),
    )(patches, w_flat, posb)

    if Ep != embed_dim:
        out = out[:, :embed_dim]
    return out.reshape(B, N, embed_dim)


if __name__ == "__main__":
    # Module defaults (CIFAR-10): img_size=32, patch_size=4, in_chans=3, embed_dim=128
    # -> N = (32/4)^2 = 64 tokens, K = 3*4*4 = 48, lane-dense Ep = 128.
    B, C, H, W = 2, 3, 32, 32
    P, E = 4, 128

    key = jax.random.PRNGKey(0)
    kx, kw, kb = jax.random.split(key, 3)
    x = jax.random.normal(kx, (B, C, H, W), dtype=jnp.float32)
    fan_in = C * P * P
    bound = 1.0 / math.sqrt(fan_in)
    conv_w = jax.random.uniform(kw, (E, C, P, P), jnp.float32, -bound, bound)
    conv_b = jax.random.uniform(kb, (E,), jnp.float32, -bound, bound)

    Hp, Wp = H // P, W // P
    N, K = Hp * Wp, C * P * P

    # One-time parameter prep (outside the traced steady-state call).
    w_flat_p, posb_p = precompute_patch_embed_params(conv_w, conv_b, N)

    fwd = jax.jit(lambda xx, ww, pp: patch_embed(xx, ww, pp, P, E))
    out = fwd(x, w_flat_p, posb_p)
    jax.block_until_ready(out)

    # References (strided conv == patchify + matmul).
    patches = x.reshape(B, C, Hp, P, Wp, P).transpose(0, 2, 4, 1, 3, 5).reshape(B, N, K)
    w_flat = conv_w.reshape(E, K).T
    pos = get_sinusoid_encoding(N, E)

    # Precision-matched reference (bf16 MXU inputs, f32 accumulate).
    ref_match = (
        jnp.dot(patches.astype(jnp.bfloat16), w_flat.astype(jnp.bfloat16),
                preferred_element_type=jnp.float32)
        + conv_b[None, None, :] + pos[None]
    )
    # Exact f32 PatchEmbed semantics (loose tolerance: bf16 input cast + bf16 out).
    ref_exact = patches @ w_flat + conv_b[None, None, :] + pos[None]

    assert out.shape == (B, N, E), out.shape
    assert out.dtype == jnp.bfloat16, out.dtype
    out_f32 = out.astype(jnp.float32)
    err_match = float(jnp.max(jnp.abs(out_f32 - ref_match)))
    err_exact = float(jnp.max(jnp.abs(out_f32 - ref_exact)))
    assert err_match < 3e-2, err_match
    assert err_exact < 1e-1, err_exact

    print("KERNEL_OK")
</pallas_src>

<mosaic_0001>
module attributes {stable_mosaic.version = 11 : i64} {
  func.func @_patch_embed_kernel(%arg0: i32, %arg1: memref<64x48xbf16, #tpu.memory_space<vmem>>, %arg2: memref<48x128xbf16, #tpu.memory_space<vmem>>, %arg3: memref<64x128xf32, #tpu.memory_space<vmem>>, %arg4: memref<64x128xbf16, #tpu.memory_space<vmem>>) attributes {dimension_semantics = [#tpu.dimension_semantics<parallel>], iteration_bounds = array<i64: 2>, scalar_prefetch = 0 : i64, scratch_operands = 0 : i64, tpu.core_type = #tpu.core_type<tc>, window_params = [{transform_indices = @transform_0, window_bounds = array<i64: 64, 48>}, {pipeline_mode = #tpu.pipeline_mode<synchronous>, transform_indices = @transform_1, window_bounds = array<i64: 48, 128>}, {pipeline_mode = #tpu.pipeline_mode<synchronous>, transform_indices = @transform_2, window_bounds = array<i64: 64, 128>}, {transform_indices = @transform_3, window_bounds = array<i64: 64, 128>}]} {
    %c0 = arith.constant 0 : index
    %c0_0 = arith.constant 0 : index
    %0 = vector.load %arg1[%c0, %c0_0] : memref<64x48xbf16, #tpu.memory_space<vmem>>, vector<64x48xbf16>
    %c0_1 = arith.constant 0 : index
    %c0_2 = arith.constant 0 : index
    %1 = vector.load %arg2[%c0_1, %c0_2] : memref<48x128xbf16, #tpu.memory_space<vmem>>, vector<48x128xbf16>
    %cst = arith.constant dense<0.000000e+00> : vector<64x128xf32>
    %2 = tpu.matmul %0, %1, %cst {dimension_numbers = #tpu.dot_dimension_numbers<[1], [0], [0], [1], [0, 0, 1, 1], [], []>} : vector<64x48xbf16>, vector<48x128xbf16>, vector<64x128xf32> -> vector<64x128xf32>
    %c0_3 = arith.constant 0 : index
    %c0_4 = arith.constant 0 : index
    %3 = vector.load %arg3[%c0_3, %c0_4] : memref<64x128xf32, #tpu.memory_space<vmem>>, vector<64x128xf32>
    %4 = arith.addf %2, %3 : vector<64x128xf32>
    %5 = arith.truncf %4 : vector<64x128xf32> to vector<64x128xbf16>
    %c0_5 = arith.constant 0 : index
    %c0_6 = arith.constant 0 : index
    %6 = vector.load %arg4[%c0_5, %c0_6] : memref<64x128xbf16, #tpu.memory_space<vmem>>, vector<64x128xbf16>
    tpu.vector_store %arg4[%c0_5, %c0_6], %5 {strides = array<i32>} : memref<64x128xbf16, #tpu.memory_space<vmem>>, vector<64x128xbf16>,
    return
  }
  func.func @transform_0(%arg0: i32) -> (i32, i32) {
    %c0_i32 = arith.constant 0 : i32
    %c0_i32_0 = arith.constant 0 : i32
    return %arg0, %c0_i32 : i32, i32
  }
  func.func @transform_1(%arg0: i32) -> (i32, i32) {
    %c0_i32 = arith.constant 0 : i32
    %c0_i32_0 = arith.constant 0 : i32
    %c0_i32_1 = arith.constant 0 : i32
    return %c0_i32, %c0_i32_0 : i32, i32
  }
  func.func @transform_2(%arg0: i32) -> (i32, i32) {
    %c0_i32 = arith.constant 0 : i32
    %c0_i32_0 = arith.constant 0 : i32
    %c0_i32_1 = arith.constant 0 : i32
    return %c0_i32, %c0_i32_0 : i32, i32
  }
  func.func @transform_3(%arg0: i32) -> (i32, i32) {
    %c0_i32 = arith.constant 0 : i32
    %c0_i32_0 = arith.constant 0 : i32
    return %arg0, %c0_i32 : i32, i32
  }
}

</mosaic_0001>

<bundles_post_ra>
// kernel: _lambda_.1
= control target key start
LH: loop header
LB: loop body
LE: loop exit
PB: predicated region body
PF: predicated region fallthrough
CT: control target
= control target key end

     0   :  { %8 = vsyncpa [#allocation3], 0  ;;  %s791_s0 = inlined_call_operand.vmem [shape: bf16[128,48], index: 0, kind: input, shape index: {}]   ;;  %s792_s1 = inlined_call_operand.vmem [shape: bf16[48,128], index: 1, kind: input, shape index: {}]   ;;  %s793_s2 = inlined_call_operand.vmem [shape: f32[64,128], index: 2, kind: input, shape index: {}]   ;;  %s794_s3 = inlined_call_operand.hbm [shape: bf16[128,128], index: 3, kind: output, shape index: {}]  }
   0x1   :  { %10 = vsyncpa [#allocation3 + $0x1], 0  ;;  %s652_s12 = smov 0   ;;  %s654_s13 = smov 0  }
   0x2   :  { %s656_s14 = smov 0   ;;  %s658_s15 = smov 0  }
   0x3 LB: > { %s673_s16 = sadd.s32 4294967295, %s627_s15   ;;  %s427_s17 = sadd.s32 4294967294, %s627_s15   ;;  %s627_s15 = sphi %s658_s15, %s800_s15   ;;  %s623_s14 = sphi %s656_s14, %s799_s14   ;;  %s619_s13 = sphi %s654_s13, %s798_s13   ;;  %s615_s12 = sphi %s652_s12, %s797_s12  }
   0x4   : > { %s677_s18 = sadd.s32 1, %s627_s15   ;;  %s91_s19 = sadd.s32 1, %s623_s14 }
   0x5   : > { %s88_s20 = ssub.s32 %s627_s15, %s677_s18  ;;  %p101_p0 = scmp.ne.s32.totalorder %s623_s14, %s619_s13 }
   0x6   : > { %p89_p1 = scmp.eq.s32.totalorder %s88_s20, 0  ;;  %p102_p2 = scmp.eq.s32.totalorder %s673_s16, 1 }
   0x7   : > { %p107_p3 = scmp.ne.s32.totalorder %s619_s13, %s615_s12  ;;  %p108_p4 = scmp.eq.s32.totalorder %s427_s17, 1 }
   0x8   : > { %s688_s21 = scalar_select %p89_p1, %s623_s14, %s91_s19  }
   0x9   : > { %p690_p5 = por %p102_p2, %p101_p0  ;;  %p694_p6 = por %p108_p4, %p107_p3 }
   0xa   : > { %p430_p7 = scmp.ge.s32.totalorder %s627_s15, 1  ;;  %p141_p8 = scmp.lt.s32.totalorder %s627_s15, 3 }
   0xc   : > { %p142_p9 = pnand %p430_p7, %p141_p8 }
   0xd   : > { %v558_v0 = vld [vmem:[%s792_s1] sm:$0xff] (!%p142_p9)   ;;  %s432_s26 = sshll.u32 (!%p142_p9), %s673_s16, 3  ;;  %v559_v1 = vld [vmem:[%s792_s1 + $0x8] sm:$0xff] (!%p142_p9)   ;;  %v560_v2 = vld [vmem:[%s792_s1 + $0x10] sm:$0xff] (!%p142_p9)   ;;  %vm233_vm0 = vcmask (!%p142_p9), 392192   ;;  %s162_s8 = sand.u32 (!%p142_p9), 1, %s619_s13  }
   0xe   : > { %145 = sbr.rel (%p142_p9) target bundleno = 260 (0x104), region = 32  ;;  %p166_p10 = scmp.lt.s32.totalorder (!%p142_p9), %s432_s26, 15  ;;  %497 = vmatprep.subr.bf16.mxu0 (!%p142_p9), %v558_v0  ;;  %511 = vmatprep.subr.bf16.mxu1 (!%p142_p9), %v558_v0  ;;  %v189_v7 = vld [vmem:[%s793_s2 + $0x10] sm:$0xff] (!%p142_p9)  ;;  %v187_v11 = vld [vmem:[%s793_s2] sm:$0xff] (!%p142_p9)  ;;  %v190_v12 = vld [vmem:[%s793_s2 + $0x18] sm:$0xff] (!%p142_p9) }
   0xf   : > { %498 = vmatpush3.bf16.msra.mxu0 (!%p142_p9), %v558_v0  ;;  %514 = vmatpush3.bf16.msra.mxu1 (!%p142_p9), %v558_v0  ;;  %s431_s9 = sshll.u32 (!%p142_p9), %s162_s8, 5  ;;  %v193_v8 = vld [vmem:[%s793_s2 + $0x30] sm:$0xff] (!%p142_p9)  ;;  %v194_v13 = vld [vmem:[%s793_s2 + $0x38] sm:$0xff] (!%p142_p9)  ;;  %v191_v16 = vld [vmem:[%s793_s2 + $0x20] sm:$0xff] (!%p142_p9)  ;;  %s466_s17 = sshll.u32 (!%p142_p9), %s673_s16, 9 }
  0x10   : > { %499 = vmatprep.subr.bf16.mxu0 (!%p142_p9), %v559_v1  ;;  %512 = vmatprep.subr.bf16.mxu1 (!%p142_p9), %v559_v1  ;;  %v188_v17 = vld [vmem:[%s793_s2 + $0x8] sm:$0xff] (!%p142_p9)  ;;  %s164_s10 = scalar_lea.vmem (!%p142_p9), [#allocation2], %s431_s9  ;;  %s746_s19 = scalar_lea.hbm (!%p142_p9), %s794_s3, %s466_s17 }
  0x11   : > { %v192_v18 = vld [vmem:[%s793_s2 + $0x28] sm:$0xff] (!%p142_p9)  ;;  %s365_s11 = sshll.u32 (!%p142_p9), %s164_s10, 4  ;;  %s750_s20 = scalar_lea.sflag (!%p142_p9), [#allocation3], %s162_s8  ;;  %s741_s11 = int_to_ptr.vmem [resolvable:$true] %s365_s11 }
  0x12   : > { %s565_s24 = scalar_lea.vmem (!%p142_p9), %s741_s11, 512  ;;  %s629_s25 = smov (!%p142_p9), [#allocation2]  }
  0x13   : > { %500 = vmatpush3.bf16.msra.mxu0 (!%p142_p9), %v559_v1  ;;  %515 = vmatpush3.bf16.msra.mxu1 (!%p142_p9), %v559_v1  ;;  %p566_p11 = scmp.ne.s32.totalorder (!%p142_p9), %s741_s11, %s565_s24 }
  0x14   : > { %501 = vmatprep.subr.bf16.mxu0 (!%p142_p9), %v560_v2  ;;  %513 = vmatprep.subr.bf16.mxu1 (!%p142_p9), %v560_v2 }
  0x15   : > { %s802_s26 = smov (!%p166_p10, %s432_s26), 15  ;;  %p567_p12 = pnand %p566_p11, %p690_p5 }
  0x16   : > { %s433_s4 = sshll.u32 %s802_s26, 2  ;;  %s569_s26 = sshll.u32 %s629_s25, 4  ;;  %s570_s26 = int_to_ptr.vmem [resolvable:$false] %s569_s26 }
  0x17   : > { %s169_s7 = scalar_lea.vmem %s791_s0, %s433_s4  ;;  %502 = vmatpush3.bf16.msra.mxu0 %v560_v2  ;;  %516 = vmatpush3.bf16.msra.mxu1 %v560_v2  ;;  %p568_p13 = pneg %p567_p12 }
  0x18   : > { %v561_v3 = vld [vmem:[%s169_s7] sm:$0xff]   ;;  %v562_v4 = vld [vmem:[%s169_s7 + $0x10] sm:$0xff]   ;;  %v563_v5 = vld [vmem:[%s169_s7 + $0x8] sm:$0xff]   ;;  %s571_s27 = scalar_lea.vmem %s570_s26, 1024  ;;  %p572_p0 = scmp.lt.s32.totalorder %s741_s11, %s570_s26 }
  0x19   : > { %503 = vmatprep.mubr.msk.bf16.mxu0 %vm233_vm0, %v561_v3  ;;  %507 = vmatprep.mubr.msk.bf16.mxu1 %vm233_vm0, %v562_v4  ;;  %v564_v6 = vld [vmem:[%s169_s7 + $0x18] sm:$0xff]   ;;  %p573_p1 = scmp.lt.s32.totalorder %s571_s27, %s565_s24 }
  0x1a   : > { %504 = vmatmul.mubr.msk.bf16.vlgmr.msra.gmra.mrb[0].mxu0 %vm233_vm0, %v563_v5  ;;  %508 = vmatmul.mubr.msk.bf16.vlgmr.msra.gmra.mrb[0].mxu1 %vm233_vm0, %v564_v6 }
  0x1b   : > { %p574_p2 = por %p573_p1, %p572_p0 }
  0x1d   : > { %p575_p3 = pnand %p574_p2, %p568_p13 }
  0xed   : > { %v505_v9 = vpop.f32.mrb[0].mxu0  ;;  %v509_v10 = vpop.f32.mrb[0].mxu1 }
  0xee   : > { %v280_v14 = vpop.f32.mrb[1].mxu0  ;;  %v296_v15 = vpop.f32.mrb[1].mxu1  ;;  %v289_v21 = vadd.f32 %v505_v9, %v189_v7  ;;  %v305_v22 = vadd.f32 %v509_v10, %v193_v8 }
  0xef   : > { %v506_v19 = vpop.f32.mrb[2].mxu0  ;;  %v510_v20 = vpop.f32.mrb[2].mxu1  ;;  %v281_v27 = vadd.f32 %v280_v14, %v187_v11  ;;  %v297_v28 = vadd.f32 %v296_v15, %v191_v16 }
  0xf0   : > { %v292_v23 = vadd.f32 %v506_v19, %v190_v12  ;;  %v308_v24 = vadd.f32 %v510_v20, %v194_v13  ;;  %v283_v25 = vpop.f32.mrb[3].mxu0  ;;  %v299_v26 = vpop.f32.mrb[3].mxu1 }
  0xf1   : > { %v284_v29 = vadd.f32 %v283_v25, %v188_v17  ;;  %v300_v30 = vadd.f32 %v299_v26, %v192_v18 }
  0xf2   : > { %v475_v31 = vpack.c.bf16 %v292_v23, %v289_v21  ;;  %v485_v32 = vpack.c.bf16 %v308_v24, %v305_v22 }
  0xf3   : > { %v470_v33 = vpack.c.bf16 %v284_v29, %v281_v27  ;;  %v480_v34 = vpack.c.bf16 %v300_v30, %v297_v28 }
  0xf4   : > { %487 = vst [vmem:[%s164_s10 + $0x8] sm:$0xff] %v475_v31   ;;  %489 = vst [vmem:[%s164_s10 + $0x18] sm:$0xff] %v485_v32  }
  0xf5   : > { %471 = vst [vmem:[%s164_s10] sm:$0xff] %v470_v33   ;;  %488 = vst [vmem:[%s164_s10 + $0x10] sm:$0xff] %v480_v34  }
  0xf6   : > { %578 = shalt.err (!%p575_p3)
}
  0xf7   : > { %s579_s8 = scalar_lea.hbm %s746_s19, 512  ;;  %s583_s30 = scalar_lea.hbm %s794_s3, 1024 }
  0xf8   : > { %p580_p4 = scmp.ne.s32.totalorder %s746_s19, %s579_s8  ;;  %p584_p9 = scmp.lt.u32.totalorder %s746_s19, %s794_s3 }
  0xf9   : > { %p585_p10 = scmp.lt.u32.totalorder %s583_s30, %s579_s8  ;;  %p587_p12 = scmp.lt.u32.totalorder %s579_s8, %s746_s19 }
  0xfa   : > { %p581_p7 = pnand %p580_p4, %p690_p5 }
  0xfb   : > { %p586_p11 = por %p585_p10, %p584_p9 }
  0xfc   : > { %p582_p8 = pneg %p581_p7 }
  0xfd   : > { %p588_p13 = por %p587_p12, %p586_p11 }
  0xff   : > { %p589_p0 = pnand %p588_p13, %p582_p8 }
 0x101   : > { %592 = shalt.err (!%p589_p0)
}
 0x102   : > { %s630_s6 = smov 64   ;;  %s631_s7 = smov 4  }
 0x103   : > { %517 = dma.vmem_to_hbm [thread:$0]  (%p690_p5), %s741_s11, 512, %s746_s19, %s750_s20, %s630_s6, %s630_s6, %s631_s7  }
 0x104 PF: > { %p523_p1 = scmp.ge.s32.totalorder %s627_s15, 2  ;;  %s380_s10 = sand.u32 1, %s615_s12  }
 0x105   : > { %s381_s17 = scalar_lea.sflag [#allocation3], %s380_s10 }
 0x106   : > { %p520_p2 = pnand %p523_p1, %p694_p6 }
 0x108   : > { %610 = dma.done.wait (!%p520_p2), %s381_s17, 512  }
 0x109   : > { %612 = vsyncadd (!%p520_p2), %s381_s17, 4294966784  ;;  %p13_p3 = scmp.ge.s32.totalorder %s677_s18, 4   ;;  %s797_s12 = smov %s619_s13 }
 0x10a   : > { %s798_s13 = smov %s623_s14  ;;  %s799_s14 = smov %s688_s21 }
 0x10b   : > { %s800_s15 = smov %s677_s18  ;;  %15 = sbr.rel (!%p13_p3) target bundleno = 3 (0x3), region = 67 }
 0x112   :  { %386 = vsyncpa [#allocation3], 1 }
 0x113   :  { %388 = vsyncpa [#allocation3 + $0x1], 1 }

</bundles_post_ra>
